<compile_context>
chip_gen: v5e
topology: v5e:2x2
jax: 0.10.0
libtpu: 0.0.40
codegen_flags: <defaults>
</compile_context>

<pallas_src>
import jax
import jax.numpy as jnp
from jax.experimental import pallas as pl
from jax.experimental.pallas import tpu as pltpu


def net_kernel(x_ref, w1_ref, b1_ref, w2_ref, b2_ref, o_ref):
    # layer1: x @ W1 + b1, ReLU   (bf16 operands, f32 accumulation/epilogue)
    h1 = jnp.dot(x_ref[...], w1_ref[...], preferred_element_type=jnp.float32)
    h1 = jnp.maximum(h1 + b1_ref[...], 0.0)
    # layer2: h1 @ W2 + b2, ReLU  (cast h1 back to bf16 for the MXU)
    h2 = jnp.dot(h1.astype(w2_ref.dtype), w2_ref[...],
                 preferred_element_type=jnp.float32)
    # final `fc` ReLU is idempotent after layer2's ReLU -> a single maximum.
    o_ref[...] = jnp.maximum(h2 + b2_ref[...], 0.0).astype(o_ref.dtype)


def _round_up(n, m):
    return ((n + m - 1) // m) * m


def net_forward(x, w1, b1, w2, b2, *, batch_tile=256):
    """x: [batch, in]  w*: [out, in] (PyTorch layout)  b*: [out] or [1, out]."""
    batch, in_dim = x.shape
    out_dim = w1.shape[0]

    # Layout / dtype prep (one-time, outside the hot kernel):
    #   weights -> [in, out] bf16, activations -> bf16, biases -> [1, out] f32.
    w1_t = jnp.asarray(w1, jnp.float32).T.astype(jnp.bfloat16)
    w2_t = jnp.asarray(w2, jnp.float32).T.astype(jnp.bfloat16)
    b1_r = jnp.asarray(b1, jnp.float32).reshape(1, out_dim)
    b2_r = jnp.asarray(b2, jnp.float32).reshape(1, out_dim)
    x_bf = x.astype(jnp.bfloat16)

    # Batch tiling: pad M to a multiple of the tile so the (8,128) block rule
    # holds; weights stay resident across the (parallel) batch grid axis.
    if batch >= batch_tile:
        tm = batch_tile
    else:
        tm = _round_up(batch, 16)  # bf16 sublane packing: multiple of 16
    padded_batch = _round_up(batch, tm)
    if padded_batch != batch:
        x_bf = jnp.pad(x_bf, ((0, padded_batch - batch), (0, 0)))
    grid = (padded_batch // tm,)

    cost = pl.CostEstimate(
        flops=2 * 2 * padded_batch * in_dim * out_dim,
        transcendentals=0,
        bytes_accessed=(x_bf.size * 2 + w1_t.size * 2 + w2_t.size * 2
                        + b1_r.size * 4 + b2_r.size * 4
                        + padded_batch * out_dim * 4),
    )

    out = pl.pallas_call(
        net_kernel,
        out_shape=jax.ShapeDtypeStruct((padded_batch, out_dim), jnp.float32),
        grid=grid,
        in_specs=[
            pl.BlockSpec((tm, in_dim), lambda i: (i, 0)),        # x tile
            pl.BlockSpec((in_dim, out_dim), lambda i: (0, 0)),   # W1 (resident)
            pl.BlockSpec((1, out_dim), lambda i: (0, 0)),        # b1 (resident)
            pl.BlockSpec((in_dim, out_dim), lambda i: (0, 0)),   # W2 (resident)
            pl.BlockSpec((1, out_dim), lambda i: (0, 0)),        # b2 (resident)
        ],
        out_specs=pl.BlockSpec((tm, out_dim), lambda i: (i, 0)),
        compiler_params=pltpu.CompilerParams(
            dimension_semantics=("parallel",),
            vmem_limit_bytes=64 << 20,
        ),
        cost_estimate=cost,
    )(x_bf, w1_t, b1_r, w2_t, b2_r)

    return out[:batch] if padded_batch != batch else out


def net_reference(x, w1, b1, w2, b2):
    h1 = jnp.maximum(x @ w1.T + b1.reshape(1, -1), 0.0)
    h2 = jnp.maximum(h1 @ w2.T + b2.reshape(1, -1), 0.0)
    return jnp.maximum(h2, 0.0)


if __name__ == "__main__":
    # inputNum == outputNum is required by the module's own forward
    # (layer2 consumes layer1's output), so both are `hidden`.
    batch, hidden = 8, 128

    key = jax.random.PRNGKey(0)
    kx, kw1, kb1, kw2, kb2 = jax.random.split(key, 5)

    x = jax.random.normal(kx, (batch, hidden), dtype=jnp.float32)
    # Deterministic PyTorch-Linear-style init: U(-1/sqrt(in), 1/sqrt(in))
    bound = 1.0 / jnp.sqrt(float(hidden))
    w1 = jax.random.uniform(kw1, (hidden, hidden), jnp.float32, -bound, bound)
    b1 = jax.random.uniform(kb1, (1, hidden), jnp.float32, -bound, bound)
    w2 = jax.random.uniform(kw2, (hidden, hidden), jnp.float32, -bound, bound)
    b2 = jax.random.uniform(kb2, (1, hidden), jnp.float32, -bound, bound)

    out = net_forward(x, w1, b1, w2, b2)
    jax.block_until_ready(out)

    ref = net_reference(x, w1, b1, w2, b2)
    assert out.shape == (batch, hidden)
    # bf16 matmul operands (f32 accumulation) -> relaxed tolerance vs f32 ref.
    assert jnp.allclose(out, ref, atol=5e-2, rtol=5e-2), "mismatch vs reference"

    print("KERNEL_OK")
</pallas_src>

<mosaic_0001>
module attributes {stable_mosaic.version = 11 : i64} {
  func.func @net_kernel(%arg0: i32, %arg1: memref<16x128xbf16, #tpu.memory_space<vmem>>, %arg2: memref<128x128xbf16, #tpu.memory_space<vmem>>, %arg3: memref<1x128xf32, #tpu.memory_space<vmem>>, %arg4: memref<128x128xbf16, #tpu.memory_space<vmem>>, %arg5: memref<1x128xf32, #tpu.memory_space<vmem>>, %arg6: memref<16x128xf32, #tpu.memory_space<vmem>>) attributes {dimension_semantics = [#tpu.dimension_semantics<parallel>], iteration_bounds = array<i64: 1>, scalar_prefetch = 0 : i64, scratch_operands = 0 : i64, tpu.core_type = #tpu.core_type<tc>, window_params = [{transform_indices = @transform_0, window_bounds = array<i64: 16, 128>}, {pipeline_mode = #tpu.pipeline_mode<synchronous>, transform_indices = @transform_1, window_bounds = array<i64: 128, 128>}, {pipeline_mode = #tpu.pipeline_mode<synchronous>, transform_indices = @transform_2, window_bounds = array<i64: 1, 128>}, {pipeline_mode = #tpu.pipeline_mode<synchronous>, transform_indices = @transform_3, window_bounds = array<i64: 128, 128>}, {pipeline_mode = #tpu.pipeline_mode<synchronous>, transform_indices = @transform_4, window_bounds = array<i64: 1, 128>}, {transform_indices = @transform_5, window_bounds = array<i64: 16, 128>}]} {
    %c0 = arith.constant 0 : index
    %c0_0 = arith.constant 0 : index
    %0 = vector.load %arg1[%c0, %c0_0] : memref<16x128xbf16, #tpu.memory_space<vmem>>, vector<16x128xbf16>
    %c0_1 = arith.constant 0 : index
    %c0_2 = arith.constant 0 : index
    %1 = vector.load %arg2[%c0_1, %c0_2] : memref<128x128xbf16, #tpu.memory_space<vmem>>, vector<128x128xbf16>
    %cst = arith.constant dense<0.000000e+00> : vector<16x128xf32>
    %2 = tpu.matmul %0, %1, %cst {dimension_numbers = #tpu.dot_dimension_numbers<[1], [0], [0], [1], [0, 0, 1, 1], [], []>} : vector<16x128xbf16>, vector<128x128xbf16>, vector<16x128xf32> -> vector<16x128xf32>
    %c0_3 = arith.constant 0 : index
    %c0_4 = arith.constant 0 : index
    %3 = vector.load %arg3[%c0_3, %c0_4] : memref<1x128xf32, #tpu.memory_space<vmem>>, vector<1x128xf32>
    %4 = vector.broadcast %3 : vector<1x128xf32> to vector<16x128xf32>
    %5 = arith.addf %2, %4 : vector<16x128xf32>
    %cst_5 = arith.constant 0.000000e+00 : f32
    %6 = vector.broadcast %cst_5 : f32 to vector<16x128xf32>
    %7 = arith.maximumf %5, %6 : vector<16x128xf32>
    %8 = arith.truncf %7 : vector<16x128xf32> to vector<16x128xbf16>
    %c0_6 = arith.constant 0 : index
    %c0_7 = arith.constant 0 : index
    %9 = vector.load %arg4[%c0_6, %c0_7] : memref<128x128xbf16, #tpu.memory_space<vmem>>, vector<128x128xbf16>
    %cst_8 = arith.constant dense<0.000000e+00> : vector<16x128xf32>
    %10 = tpu.matmul %8, %9, %cst_8 {dimension_numbers = #tpu.dot_dimension_numbers<[1], [0], [0], [1], [0, 0, 1, 1], [], []>} : vector<16x128xbf16>, vector<128x128xbf16>, vector<16x128xf32> -> vector<16x128xf32>
    %c0_9 = arith.constant 0 : index
    %c0_10 = arith.constant 0 : index
    %11 = vector.load %arg5[%c0_9, %c0_10] : memref<1x128xf32, #tpu.memory_space<vmem>>, vector<1x128xf32>
    %12 = vector.broadcast %11 : vector<1x128xf32> to vector<16x128xf32>
    %13 = arith.addf %10, %12 : vector<16x128xf32>
    %cst_11 = arith.constant 0.000000e+00 : f32
    %14 = vector.broadcast %cst_11 : f32 to vector<16x128xf32>
    %15 = arith.maximumf %13, %14 : vector<16x128xf32>
    %c0_12 = arith.constant 0 : index
    %c0_13 = arith.constant 0 : index
    %16 = vector.load %arg6[%c0_12, %c0_13] : memref<16x128xf32, #tpu.memory_space<vmem>>, vector<16x128xf32>
    tpu.vector_store %arg6[%c0_12, %c0_13], %15 {strides = array<i32>} : memref<16x128xf32, #tpu.memory_space<vmem>>, vector<16x128xf32>,
    return
  }
  func.func @transform_0(%arg0: i32) -> (i32, i32) {
    %c0_i32 = arith.constant 0 : i32
    %c0_i32_0 = arith.constant 0 : i32
    return %arg0, %c0_i32 : i32, i32
  }
  func.func @transform_1(%arg0: i32) -> (i32, i32) {
    %c0_i32 = arith.constant 0 : i32
    %c0_i32_0 = arith.constant 0 : i32
    %c0_i32_1 = arith.constant 0 : i32
    return %c0_i32, %c0_i32_0 : i32, i32
  }
  func.func @transform_2(%arg0: i32) -> (i32, i32) {
    %c0_i32 = arith.constant 0 : i32
    %c0_i32_0 = arith.constant 0 : i32
    %c0_i32_1 = arith.constant 0 : i32
    return %c0_i32, %c0_i32_0 : i32, i32
  }
  func.func @transform_3(%arg0: i32) -> (i32, i32) {
    %c0_i32 = arith.constant 0 : i32
    %c0_i32_0 = arith.constant 0 : i32
    %c0_i32_1 = arith.constant 0 : i32
    return %c0_i32, %c0_i32_0 : i32, i32
  }
  func.func @transform_4(%arg0: i32) -> (i32, i32) {
    %c0_i32 = arith.constant 0 : i32
    %c0_i32_0 = arith.constant 0 : i32
    %c0_i32_1 = arith.constant 0 : i32
    return %c0_i32, %c0_i32_0 : i32, i32
  }
  func.func @transform_5(%arg0: i32) -> (i32, i32) {
    %c0_i32 = arith.constant 0 : i32
    %c0_i32_0 = arith.constant 0 : i32
    return %arg0, %c0_i32 : i32, i32
  }
}

</mosaic_0001>

<bundles_post_ra>
// kernel: tpu_custom_call.1
= control target key start
LH: loop header
LB: loop body
LE: loop exit
PB: predicated region body
PF: predicated region fallthrough
CT: control target
= control target key end

     0   :  { %10 = vsyncpa [#allocation3], 0  ;;  %s520_s0 = inlined_call_operand.hbm [shape: bf16[16,128], index: 0, kind: input, shape index: {}]   ;;  %s521_s1 = inlined_call_operand.hbm [shape: bf16[128,128], index: 1, kind: input, shape index: {}]   ;;  %s522_s2 = inlined_call_operand.vmem [shape: f32[1,128], index: 2, kind: input, shape index: {}]   ;;  %s523_s3 = inlined_call_operand.hbm [shape: bf16[128,128], index: 3, kind: input, shape index: {}]   ;;  %s524_s4 = inlined_call_operand.vmem [shape: f32[1,128], index: 4, kind: input, shape index: {}]   ;;  %s525_s5 = inlined_call_operand.hbm [shape: f32[16,128], index: 5, kind: output, shape index: {}]  }
   0x1   :  { %11 = vsyncpa [#allocation6], 0 }
   0x2   :  { %12 = vsyncpa [#allocation4], 0  ;;  %s30_s20 = sshll.u32 %s521_s1, 4  ;;  %s464_s21 = smov [#allocation5]   ;;  %s31_s20 = int_to_ptr.hbm [resolvable:$true] %s30_s20 }
   0x3   :  { %s32_s22 = sshll.u32 %s464_s21, 4  ;;  %s17_s25 = sshll.u32 %s520_s0, 4  ;;  %s33_s22 = int_to_ptr.vmem [resolvable:$true] %s32_s22  ;;  %s18_s25 = int_to_ptr.hbm [resolvable:$true] %s17_s25 }
   0x4   :  { %s465_s26 = smov 64   ;;  %s466_s27 = smov 4  }
   0x5   :  { %38 = dma.hbm_to_vmem [thread:$0]  %s31_s20, 1024, %s33_s22, [#allocation6], %s465_s26, %s465_s26, %s466_s27  }
   0x6   :  { %s467_s28 = smov [#allocation2]   ;;  %s45_s7 = sshll.u32 %s523_s3, 4  ;;  %s46_s7 = int_to_ptr.hbm [resolvable:$true] %s45_s7 }
   0x7   :  { %s19_s29 = sshll.u32 %s467_s28, 4  ;;  %s468_s1 = smov [#allocation7]   ;;  %s20_s29 = int_to_ptr.vmem [resolvable:$true] %s19_s29 }
   0x8   :  { %25 = dma.hbm_to_vmem [thread:$0]  %s18_s25, 128, %s20_s29, [#allocation3], %s465_s26, %s465_s26, %s466_s27  }
   0x9   :  { %s47_s8 = sshll.u32 %s468_s1, 4  ;;  %s48_s8 = int_to_ptr.vmem [resolvable:$true] %s47_s8 }
   0xa   :  { %53 = dma.hbm_to_vmem [thread:$0]  %s46_s7, 1024, %s48_s8, [#allocation6], %s465_s26, %s465_s26, %s466_s27  }
   0xb   :  { %458 = dma.done.wait [#allocation3], 128  }
   0xc   :  { %459 = vsyncadd [#allocation3], 4294967168 }
   0xd   :  { %460 = dma.done.wait [#allocation6], 2048  }
   0xe   :  { %461 = vsyncadd [#allocation6], 4294965248  ;;  %v343_v0 = vld [vmem:[#allocation5 + $0x38] sm:$0xff]  ;;  %v342_v1 = vld [vmem:[#allocation5 + $0x30] sm:$0xff]  ;;  %s469_s11 = smov [#allocation8]   ;;  %s470_s15 = smov 128  }
   0xf   :  { %144 = vmatpush.bf16.msra.mxu0 %v343_v0  ;;  %v351_v2 = vld [vmem:[#allocation7 + $0x38] sm:$0xff]  ;;  %v350_v3 = vld [vmem:[#allocation7 + $0x30] sm:$0xff]  ;;  %v341_v4 = vld [vmem:[#allocation5 + $0x28] sm:$0xff]  ;;  %s251_s12 = sshll.u32 %s469_s11, 4  ;;  %s471_s16 = smov 8   ;;  %s252_s12 = int_to_ptr.vmem [resolvable:$true] %s251_s12 }
  0x10   :  { %229 = vmatpush.bf16.msra.mxu1 %v351_v2  ;;  %v349_v5 = vld [vmem:[#allocation7 + $0x28] sm:$0xff]  ;;  %v340_v6 = vld [vmem:[#allocation5 + $0x20] sm:$0xff]  ;;  %v339_v8 = vld [vmem:[#allocation5 + $0x18] sm:$0xff] }
  0x11   :  { %v348_v7 = vld [vmem:[#allocation7 + $0x20] sm:$0xff]  ;;  %v338_v9 = vld [vmem:[#allocation5 + $0x10] sm:$0xff]  ;;  %v337_v10 = vld [vmem:[#allocation5 + $0x8] sm:$0xff] }
  0x12   :  { %v336_v11 = vld [vmem:[#allocation5] sm:$0xff]  ;;  %v335_v12 = vld [vmem:[#allocation2] sm:$0xff]  ;;  %v346_v14 = vld [vmem:[#allocation7 + $0x10] sm:$0xff] }
  0x13   :  { %145 = vmatpush.bf16.msra.mxu0 %v342_v1  ;;  %v347_v13 = vld [vmem:[#allocation7 + $0x18] sm:$0xff]  ;;  %v345_v15 = vld [vmem:[#allocation7 + $0x8] sm:$0xff]  ;;  %v344_v16 = vld [vmem:[#allocation7] sm:$0xff] }
  0x14   :  { %230 = vmatpush.bf16.msra.mxu1 %v350_v3  ;;  %v360_v18 = vld [vmem:[%s522_s2] ss:$0 sm:$0xff]  ;;  %s253_s2 = sshll.u32 %s525_s5, 4  ;;  %s254_s2 = int_to_ptr.hbm [resolvable:$true] %s253_s2 }
  0x15   :  { %v361_v25 = vld [vmem:[%s524_s4] ss:$0 sm:$0xff] }
  0x17   :  { %146 = vmatpush.bf16.msra.mxu0 %v341_v4 }
  0x18   :  { %231 = vmatpush.bf16.msra.mxu1 %v349_v5 }
  0x1b   :  { %147 = vmatpush.bf16.msra.mxu0 %v340_v6 }
  0x1c   :  { %232 = vmatpush.bf16.msra.mxu1 %v348_v7 }
  0x1f   :  { %148 = vmatpush.bf16.msra.mxu0 %v339_v8 }
  0x20   :  { %233 = vmatpush.bf16.msra.mxu1 %v347_v13 }
  0x23   :  { %149 = vmatpush.bf16.msra.mxu0 %v338_v9 }
  0x24   :  { %234 = vmatpush.bf16.msra.mxu1 %v346_v14 }
  0x27   :  { %150 = vmatpush.bf16.msra.mxu0 %v337_v10 }
  0x28   :  { %235 = vmatpush.bf16.msra.mxu1 %v345_v15 }
  0x2b   :  { %151 = vmatpush.bf16.msra.mxu0 %v336_v11 }
  0x2c   :  { %236 = vmatpush.bf16.msra.mxu1 %v344_v16 }
  0x2e   :  { %152 = vmatmul.bf16.vlgmr.msra.gmra.mxu0 %v335_v12 }
  0xab   :  { %v153_v17 = vpop.f32.mrf.mxu0 }
  0xac   :  { %v154_v19 = vadd.f32 %v360_v18, %v153_v17 }
  0xae   :  { %v158_v22 = vmax.f32 %v154_v19, 0.0 }
  0xb3   :  { %v155_v20 = vpop.f32.mrf.mxu0 }
  0xb4   :  { %v156_v21 = vadd.f32 %v360_v18, %v155_v20 }
  0xb6   :  { %v159_v23 = vmax.f32 %v156_v21, 0.0 }
  0xb8   :  { %v160_v24 = vpack.c.bf16 %v159_v23, %v158_v22 }
  0xba   :  { %237 = vmatmul.bf16.vlgmr.msra.gmra.mxu1 %v160_v24 }
 0x137   :  { %v238_v26 = vpop.f32.mrf.mxu1 }
 0x138   :  { %v239_v27 = vadd.f32 %v361_v25, %v238_v26 }
 0x13a   :  { %v243_v28 = vmax.f32 %v239_v27, 0.0 }
 0x13c   :  { %245 = vst [vmem:[#allocation8] sm:$0xff] %v243_v28 }
 0x13f   :  { %v240_v29 = vpop.f32.mrf.mxu1 }
 0x140   :  { %v241_v30 = vadd.f32 %v361_v25, %v240_v29 }
 0x142   :  { %v244_v31 = vmax.f32 %v241_v30, 0.0 }
 0x144   :  { %246 = vst [vmem:[#allocation8 + $0x8] sm:$0xff] %v244_v31 }
 0x145   :  { %259 = dma.vmem_to_hbm [thread:$0]  %s252_s12, 256, %s254_s2, [#allocation4], %s470_s15, %s470_s15, %s471_s16  }
 0x146   :  { %462 = dma.done.wait [#allocation4], 256  }
 0x147   :  { %463 = vsyncadd [#allocation4], 4294967040 }
 0x148   :  { %264 = vsyncpa [#allocation3], 1 }
 0x149   :  { %265 = vsyncpa [#allocation6], 1 }
 0x14a   :  { %266 = vsyncpa [#allocation4], 1 }

</bundles_post_ra>
